<compile_context>
chip_gen: v7x
topology: tpu7x:2x2x1
jax: 0.10.0
libtpu: 0.0.40
codegen_flags: <defaults>
</compile_context>

<pallas_src>
import jax
import jax.numpy as jnp
from jax.experimental import pallas as pl


# ----------------------------------------------------------------------------
# Fused Pallas kernel: conv-matmul + BatchNorm(batch stats) + ReLU
# ----------------------------------------------------------------------------
def _upblock_fused_kernel(cols_ref, w_ref, b_ref, gamma_ref, beta_ref, o_ref):
    # cols: (Kd, M) bf16      -- im2col^T, M = N*H2*W2 (batch merged, lane axis)
    # w:    (Cout, Kd) bf16   -- conv weight, Kd = Cin*K*K
    # b / gamma / beta: (Cout, 1) f32
    # o:    (Cout, M) f32
    y = jnp.dot(w_ref[...], cols_ref[...], preferred_element_type=jnp.float32)
    y = y + b_ref[...]                                    # conv bias
    # BatchNorm2d, training mode: biased batch statistics over (N, H, W) == M.
    mean = jnp.mean(y, axis=1, keepdims=True)             # (Cout, 1)
    centered = y - mean
    var = jnp.mean(centered * centered, axis=1, keepdims=True)
    scale = gamma_ref[...] * jax.lax.rsqrt(var + 1e-5)    # EUP rsqrt
    o_ref[...] = jnp.maximum(centered * scale + beta_ref[...], 0.0)


# ----------------------------------------------------------------------------
# Wrapper: upsample + im2col glue + fused pallas_call
# ----------------------------------------------------------------------------
def _im2col_T(x_nchw, K, pad):
    """x: (N, Cin, H, W) -> cols^T of shape (Cin*K*K, N*H*W).

    Row ordering is (cin, ky, kx), matching torch weight.reshape(Cout, Cin*K*K).
    """
    N, Cin, H, W = x_nchw.shape
    xp = jnp.pad(x_nchw, ((0, 0), (0, 0), (pad, pad), (pad, pad)))
    taps = [xp[:, :, dy:dy + H, dx:dx + W] for dy in range(K) for dx in range(K)]
    cols = jnp.stack(taps, axis=2)                        # (N, Cin, K*K, H, W)
    cols = cols.transpose(1, 2, 0, 3, 4).reshape(Cin * K * K, N * H * W)
    return cols


@jax.jit
def up_block2d_forward(x, params):
    """x: (N, Cin, H, W) float32 (NCHW, same as PyTorch).

    Returns (N, Cout, 2H, 2W) float32 = relu(BN(conv3x3(upsample2x(x)))).
    """
    N, Cin, H, W = x.shape
    w = params['conv_w']                                  # (Cout, Cin, K, K)
    Cout, _, K, _ = w.shape
    pad = 1

    # 1) F.interpolate(scale_factor=2), default mode='nearest'  (plain JAX glue)
    xu = jnp.repeat(jnp.repeat(x, 2, axis=2), 2, axis=3)
    H2, W2 = 2 * H, 2 * W

    # 2) im2col^T (glue), built once.
    cols = _im2col_T(xu, K, pad)                          # (Cin*K*K, N*H2*W2)
    wmat = w.reshape(Cout, Cin * K * K)
    M = N * H2 * W2

    # 3) fused conv + BN + ReLU in one Pallas kernel (single VMEM block).
    out = pl.pallas_call(
        _upblock_fused_kernel,
        out_shape=jax.ShapeDtypeStruct((Cout, M), jnp.float32),
    )(
        cols.astype(jnp.bfloat16),
        wmat.astype(jnp.bfloat16),
        params['conv_b'].reshape(Cout, 1).astype(jnp.float32),
        params['bn_gamma'].reshape(Cout, 1).astype(jnp.float32),
        params['bn_beta'].reshape(Cout, 1).astype(jnp.float32),
    )

    # 4) back to NCHW (layout plumbing only).
    return out.reshape(Cout, N, H2, W2).transpose(1, 0, 2, 3)


# ----------------------------------------------------------------------------
# Plain-JAX reference (same bf16-rounded matmul inputs, f32 exact math)
# ----------------------------------------------------------------------------
def _reference(x, params, eps=1e-5):
    N, Cin, H, W = x.shape
    w = params['conv_w']
    Cout, _, K, _ = w.shape
    xu = jnp.repeat(jnp.repeat(x, 2, axis=2), 2, axis=3)
    H2, W2 = 2 * H, 2 * W
    cols = _im2col_T(xu, K, 1).astype(jnp.bfloat16).astype(jnp.float32)
    wmat = w.reshape(Cout, Cin * K * K).astype(jnp.bfloat16).astype(jnp.float32)
    y = jnp.dot(wmat, cols, precision=jax.lax.Precision.HIGHEST)
    y = y + params['conv_b'][:, None]
    mean = y.mean(axis=1, keepdims=True)
    var = ((y - mean) ** 2).mean(axis=1, keepdims=True)
    y = (y - mean) * (params['bn_gamma'][:, None] / jnp.sqrt(var + eps)) \
        + params['bn_beta'][:, None]
    y = jnp.maximum(y, 0.0)
    return y.reshape(Cout, N, H2, W2).transpose(1, 0, 2, 3)


# ----------------------------------------------------------------------------
# main
# ----------------------------------------------------------------------------
if __name__ == "__main__":
    N, Cin, H, W = 2, 4, 16, 16
    Cout, K = 32, 3

    key = jax.random.PRNGKey(0)
    k1, k2, k3, k4, k5 = jax.random.split(key, 5)
    params = {
        'conv_w': jax.random.normal(k1, (Cout, Cin, K, K), jnp.float32)
                  * (1.0 / (Cin * K * K)) ** 0.5,
        'conv_b': 0.1 * jax.random.normal(k2, (Cout,), jnp.float32),
        'bn_gamma': 1.0 + 0.1 * jax.random.normal(k3, (Cout,), jnp.float32),
        'bn_beta': 0.1 * jax.random.normal(k4, (Cout,), jnp.float32),
    }
    x = jax.random.uniform(k5, (N, Cin, H, W), jnp.float32)

    out = up_block2d_forward(x, params)
    jax.block_until_ready(out)

    assert out.shape == (N, Cout, 2 * H, 2 * W)
    assert bool(jnp.isfinite(out).all())

    ref = _reference(x, params)
    assert bool(jnp.allclose(out, ref, atol=5e-3, rtol=5e-3)), \
        float(jnp.max(jnp.abs(out - ref)))

    print("KERNEL_OK")
</pallas_src>

<mosaic_0001>
module attributes {stable_mosaic.version = 11 : i64} {
  func.func @_upblock_fused_kernel(%arg0: memref<36x2048xbf16, #tpu.memory_space<vmem>>, %arg1: memref<32x36xbf16, #tpu.memory_space<vmem>>, %arg2: memref<32x1xf32, #tpu.memory_space<vmem>>, %arg3: memref<32x1xf32, #tpu.memory_space<vmem>>, %arg4: memref<32x1xf32, #tpu.memory_space<vmem>>, %arg5: memref<32x2048xf32, #tpu.memory_space<vmem>>) attributes {dimension_semantics = [], scalar_prefetch = 0 : i64, scratch_operands = 0 : i64, tpu.core_type = #tpu.core_type<tc>} {
    %c0 = arith.constant 0 : index
    %c0_0 = arith.constant 0 : index
    %0 = vector.load %arg1[%c0, %c0_0] : memref<32x36xbf16, #tpu.memory_space<vmem>>, vector<32x36xbf16>
    %c0_1 = arith.constant 0 : index
    %c0_2 = arith.constant 0 : index
    %1 = vector.load %arg0[%c0_1, %c0_2] : memref<36x2048xbf16, #tpu.memory_space<vmem>>, vector<36x2048xbf16>
    %cst = arith.constant dense<0.000000e+00> : vector<32x2048xf32>
    %2 = tpu.matmul %0, %1, %cst {dimension_numbers = #tpu.dot_dimension_numbers<[1], [0], [0], [1], [0, 0, 1, 1], [], []>} : vector<32x36xbf16>, vector<36x2048xbf16>, vector<32x2048xf32> -> vector<32x2048xf32>
    %c0_3 = arith.constant 0 : index
    %c0_4 = arith.constant 0 : index
    %3 = vector.load %arg2[%c0_3, %c0_4] : memref<32x1xf32, #tpu.memory_space<vmem>>, vector<32x1xf32>
    %4 = vector.broadcast %3 : vector<32x1xf32> to vector<32x2048xf32>
    %5 = arith.addf %2, %4 : vector<32x2048xf32>
    %cst_5 = arith.constant dense<0.000000e+00> : vector<32xf32>
    %6 = vector.multi_reduction <add>, %5, %cst_5 [1] : vector<32x2048xf32> to vector<32xf32>
    %7 = vector.shape_cast %6 : vector<32xf32> to vector<32x1xf32>
    %cst_6 = arith.constant 2.048000e+03 : f32
    %8 = vector.broadcast %cst_6 : f32 to vector<32x1xf32>
    %9 = arith.divf %7, %8 : vector<32x1xf32>
    %10 = vector.broadcast %9 : vector<32x1xf32> to vector<32x2048xf32>
    %11 = arith.subf %5, %10 : vector<32x2048xf32>
    %12 = arith.mulf %11, %11 : vector<32x2048xf32>
    %cst_7 = arith.constant dense<0.000000e+00> : vector<32xf32>
    %13 = vector.multi_reduction <add>, %12, %cst_7 [1] : vector<32x2048xf32> to vector<32xf32>
    %14 = vector.shape_cast %13 : vector<32xf32> to vector<32x1xf32>
    %cst_8 = arith.constant 2.048000e+03 : f32
    %15 = vector.broadcast %cst_8 : f32 to vector<32x1xf32>
    %16 = arith.divf %14, %15 : vector<32x1xf32>
    %c0_9 = arith.constant 0 : index
    %c0_10 = arith.constant 0 : index
    %17 = vector.load %arg3[%c0_9, %c0_10] : memref<32x1xf32, #tpu.memory_space<vmem>>, vector<32x1xf32>
    %cst_11 = arith.constant 9.99999974E-6 : f32
    %18 = vector.broadcast %cst_11 : f32 to vector<32x1xf32>
    %19 = arith.addf %16, %18 : vector<32x1xf32>
    %20 = math.rsqrt %19 : vector<32x1xf32>
    %21 = arith.mulf %17, %20 : vector<32x1xf32>
    %22 = vector.broadcast %21 : vector<32x1xf32> to vector<32x2048xf32>
    %23 = arith.mulf %11, %22 : vector<32x2048xf32>
    %c0_12 = arith.constant 0 : index
    %c0_13 = arith.constant 0 : index
    %24 = vector.load %arg4[%c0_12, %c0_13] : memref<32x1xf32, #tpu.memory_space<vmem>>, vector<32x1xf32>
    %25 = vector.broadcast %24 : vector<32x1xf32> to vector<32x2048xf32>
    %26 = arith.addf %23, %25 : vector<32x2048xf32>
    %cst_14 = arith.constant 0.000000e+00 : f32
    %27 = vector.broadcast %cst_14 : f32 to vector<32x2048xf32>
    %28 = arith.maximumf %26, %27 : vector<32x2048xf32>
    %c0_15 = arith.constant 0 : index
    %c0_16 = arith.constant 0 : index
    %29 = vector.load %arg5[%c0_15, %c0_16] : memref<32x2048xf32, #tpu.memory_space<vmem>>, vector<32x2048xf32>
    tpu.vector_store %arg5[%c0_15, %c0_16], %28 {strides = array<i32>} : memref<32x2048xf32, #tpu.memory_space<vmem>>, vector<32x2048xf32>,
    return
  }
}

</mosaic_0001>

<bundles_post_ra>
// kernel: up_block2d_forward.1
= control target key start
LH: loop header
LB: loop body
LE: loop exit
PB: predicated region body
PF: predicated region fallthrough
CT: control target
= control target key end

     0   :  { %v1475_v3 = vmov 0   ;;  %vm306_vm0 = vcmask 1041408   ;;  %vm299_vm1 = vcmask 293888   ;;  %s2650_s0 = inlined_call_operand.vmem [shape: bf16[36,2048], index: 0, kind: input, shape index: {}]   ;;  %s2651_s1 = inlined_call_operand.vmem [shape: bf16[32,36], index: 1, kind: input, shape index: {}]   ;;  %s2652_s2 = inlined_call_operand.vmem [shape: f32[32,1], index: 2, kind: input, shape index: {}]   ;;  %s2653_s4 = inlined_call_operand.vmem [shape: f32[32,1], index: 4, kind: input, shape index: {}]   ;;  %s2654_s3 = inlined_call_operand.vmem [shape: f32[32,1], index: 3, kind: input, shape index: {}]   ;;  %s2655_s5 = inlined_call_operand.vmem [shape: f32[32,2048], index: 5, kind: output, shape index: {}]  }
   0x1   :  { %v25_v0 = vld [vmem:[%s2650_s0] sm:$0xff]  ;;  %v26_v2 = vld [vmem:[%s2650_s0 + $0x8] sm:$0xff]  ;;  %387 = vmatprep.mubr.bf16.mxu0 %v1475_v3  ;;  %440 = vmatprep.mubr.bf16.mxu1 %v1475_v3  ;;  %v27_v21 = vld [vmem:[%s2650_s0 + $0x10] sm:$0xff] }
   0x2   :  { %v33_v1 = vld [vmem:[%s2650_s0 + $0x40] sm:$0xff]  ;;  %v34_v5 = vld [vmem:[%s2650_s0 + $0x48] sm:$0xff]  ;;  %1447 = vset.pattern.permute.xlu0 %v1475_v3  ;;  %1448 = vset.pattern.permute.xlu1 %v1475_v3  ;;  %v35_v24 = vld [vmem:[%s2650_s0 + $0x50] sm:$0xff] }
   0x3   :  { %v1375_v4 = vcombine.high %v25_v0, %v33_v1  ;;  %v1374_v6 = vcombine.low %v25_v0, %v33_v1  ;;  %v41_v7 = vld [vmem:[%s2650_s0 + $0x80] sm:$0xff]  ;;  %v1377_v9 = vcombine.high %v26_v2, %v34_v5  ;;  %v1376_v10 = vcombine.low %v26_v2, %v34_v5  ;;  %v42_v12 = vld [vmem:[%s2650_s0 + $0x88] sm:$0xff]  ;;  %v28_v25 = vld [vmem:[%s2650_s0 + $0x18] sm:$0xff] }
   0x4   :  { %v49_v8 = vld [vmem:[%s2650_s0 + $0xc0] sm:$0xff]  ;;  %v50_v13 = vld [vmem:[%s2650_s0 + $0xc8] sm:$0xff]  ;;  %v36_v26 = vld [vmem:[%s2650_s0 + $0x58] sm:$0xff]  ;;  %v1379_v28 = vcombine.high %v27_v21, %v35_v24  ;;  %v1378_v34 = vcombine.low %v27_v21, %v35_v24 }
   0x5   :  { %v1391_v11 = vcombine.high %v41_v7, %v49_v8  ;;  %v57_v14 = vld [vmem:[%s2650_s0 + $0x100] sm:$0x33]  ;;  %355 = vmatprep.subr.bf16.mxu0 %v1375_v4  ;;  %v1393_v15 = vcombine.high %v42_v12, %v50_v13  ;;  %v58_v16 = vld [vmem:[%s2650_s0 + $0x108] sm:$0x33]  ;;  %408 = vmatprep.subr.bf16.mxu1 %v1377_v9  ;;  %v1390_v17 = vcombine.low %v41_v7, %v49_v8  ;;  %v43_v31 = vld [vmem:[%s2650_s0 + $0x90] sm:$0xff] }
   0x6   :  { %356 = vmatpush1.bf16.msra.mxu0 %v1374_v6  ;;  %409 = vmatpush1.bf16.msra.mxu1 %v1376_v10  ;;  %v1392_v18 = vcombine.low %v42_v12, %v50_v13  ;;  %v1407_v19 = vcombine.high %v57_v14, %v57_v14  ;;  %v1406_v20 = vcombine.low %v57_v14, %v57_v14  ;;  %v51_v32 = vld [vmem:[%s2650_s0 + $0xd0] sm:$0xff]  ;;  %v1565_v33 = vld [vmem:[%s2651_s1] sm:$0xff]   ;;  %v44_v35 = vld [vmem:[%s2650_s0 + $0x98] sm:$0xff] }
   0x7   :  { %357 = vmatprep.subr.bf16.mxu0 %v1391_v11  ;;  %410 = vmatprep.subr.bf16.mxu1 %v1393_v15  ;;  %v1409_v22 = vcombine.high %v58_v16, %v58_v16  ;;  %v1408_v23 = vcombine.low %v58_v16, %v58_v16  ;;  %v1381_v30 = vcombine.high %v28_v25, %v36_v26  ;;  %v52_v36 = vld [vmem:[%s2650_s0 + $0xd8] sm:$0xff]  ;;  %v59_v39 = vld [vmem:[%s2650_s0 + $0x110] sm:$0x33]  ;;  %v65_v43 = vld [vmem:[%s2652_s2] sm:$0xff] }
   0x8   :  { %v308_v27 = vsel %vm306_vm0, %v1406_v20, 0  ;;  %v1380_v37 = vcombine.low %v28_v25, %v36_v26  ;;  %v1395_v38 = vcombine.high %v43_v31, %v51_v32  ;;  %v1397_v40 = vcombine.high %v44_v35, %v52_v36  ;;  %v60_v41 = vld [vmem:[%s2650_s0 + $0x118] sm:$0x33]  ;;  %v67_v47 = vld [vmem:[%s2652_s2 + $0x10] sm:$0xff]  ;;  %v1594_v50 = vld [vmem:[%s2651_s1 + $0x8] sm:$0xff]   ;;  %71 = vperm.xlu0 %1447, %v65_v43  }
   0x9   :  { %v314_v29 = vsel %vm306_vm0, %v1408_v23, 0  ;;  %v1394_v42 = vcombine.low %v43_v31, %v51_v32  ;;  %v1396_v44 = vcombine.low %v44_v35, %v52_v36  ;;  %v1411_v45 = vcombine.high %v59_v39, %v59_v39  ;;  %v29_v51 = vld [vmem:[%s2650_s0 + $0x20] sm:$0xff]  ;;  %v30_v53 = vld [vmem:[%s2650_s0 + $0x28] sm:$0xff]  ;;  %81 = vperm.xlu1 %1448, %v67_v47   ;;  %v68_v60 = vld [vmem:[%s2652_s2 + $0x18] sm:$0xff] }
   0xa   :  { %358 = vmatpush1.bf16.msra.mxu0 %v1390_v17  ;;  %411 = vmatpush1.bf16.msra.mxu1 %v1392_v18  ;;  %v1410_v46 = vcombine.low %v59_v39, %v59_v39  ;;  %v1413_v48 = vcombine.high %v60_v41, %v60_v41  ;;  %v1412_v49 = vcombine.low %v60_v41, %v60_v41  ;;  %v37_v52 = vld [vmem:[%s2650_s0 + $0x60] sm:$0xff]  ;;  %v38_v54 = vld [vmem:[%s2650_s0 + $0x68] sm:$0xff]  ;;  %v31_v14 = vld [vmem:[%s2650_s0 + $0x30] sm:$0xff] }
   0xb   :  { %1422 = vmatprep.subr.msk.bf16.mxu0 %vm306_vm0, %v1407_v19  ;;  %1425 = vmatprep.subr.msk.bf16.mxu1 %vm306_vm0, %v1409_v22  ;;  %v66_v55 = vld [vmem:[%s2652_s2 + $0x8] sm:$0xff]  ;;  %v1383_v58 = vcombine.high %v29_v51, %v37_v52  ;;  %v1385_v59 = vcombine.high %v30_v53, %v38_v54  ;;  %v45_v61 = vld [vmem:[%s2650_s0 + $0xa0] sm:$0xff]  ;;  %v1382_v63 = vcombine.low %v29_v51, %v37_v52  ;;  %v39_v15 = vld [vmem:[%s2650_s0 + $0x70] sm:$0xff] }
   0xc   :  { %v320_v56 = vsel %vm306_vm0, %v1410_v46, 0  ;;  %v326_v57 = vsel %vm306_vm0, %v1412_v49, 0  ;;  %76 = vperm.xlu0 %1447, %v66_v55   ;;  %v53_v62 = vld [vmem:[%s2650_s0 + $0xe0] sm:$0xff]  ;;  %v46_v0 = vld [vmem:[%s2650_s0 + $0xa8] sm:$0xff]  ;;  %v1384_v2 = vcombine.low %v30_v53, %v38_v54  ;;  %v32_v16 = vld [vmem:[%s2650_s0 + $0x38] sm:$0xff]  ;;  %v1387_v20 = vcombine.high %v31_v14, %v39_v15 }
   0xd   :  { %86 = vperm.xlu1 %1448, %v68_v60   ;;  %v54_v1 = vld [vmem:[%s2650_s0 + $0xe8] sm:$0xff]  ;;  %v1399_v4 = vcombine.high %v45_v61, %v53_v62  ;;  %v61_v5 = vld [vmem:[%s2650_s0 + $0x120] sm:$0x33]  ;;  %v1398_v8 = vcombine.low %v45_v61, %v53_v62  ;;  %v40_v17 = vld [vmem:[%s2650_s0 + $0x78] sm:$0xff]  ;;  %v1386_v24 = vcombine.low %v31_v14, %v39_v15 }
   0xe   :  { %360 = vmatpush1.bf16.msra.mxu0 %v308_v27  ;;  %413 = vmatpush1.bf16.msra.mxu1 %v314_v29  ;;  %v1401_v6 = vcombine.high %v46_v0, %v54_v1  ;;  %v62_v7 = vld [vmem:[%s2650_s0 + $0x128] sm:$0x33]  ;;  %v1400_v9 = vcombine.low %v46_v0, %v54_v1  ;;  %v1415_v10 = vcombine.high %v61_v5, %v61_v5  ;;  %v47_v22 = vld [vmem:[%s2650_s0 + $0xb0] sm:$0xff]  ;;  %v48_v25 = vld [vmem:[%s2650_s0 + $0xb8] sm:$0xff] }
   0xf   :  { %461 = vmatprep.subr.bf16.mxu0 %v1379_v28  ;;  %514 = vmatprep.subr.bf16.mxu1 %v1381_v30  ;;  %v1414_v11 = vcombine.low %v61_v5, %v61_v5  ;;  %v1417_v12 = vcombine.high %v62_v7, %v62_v7  ;;  %v1416_v13 = vcombine.low %v62_v7, %v62_v7  ;;  %v55_v23 = vld [vmem:[%s2650_s0 + $0xf0] sm:$0xff]  ;;  %v56_v26 = vld [vmem:[%s2650_s0 + $0xf8] sm:$0xff] }
  0x10   :  { %v1389_v21 = vcombine.high %v32_v16, %v40_v17  ;;  %v1388_v27 = vcombine.low %v32_v16, %v40_v17  ;;  %v1403_v28 = vcombine.high %v47_v22, %v55_v23  ;;  %v63_v29 = vld [vmem:[%s2650_s0 + $0x130] sm:$0x33]  ;;  %v1405_v30 = vcombine.high %v48_v25, %v56_v26  ;;  %v64_v31 = vld [vmem:[%s2650_s0 + $0x138] sm:$0x33] }
  0x11   :  { %1423 = vmatmul.mubr.msk.bf16.vlgmr.msra.gmra.mrb[0].mxu0 %vm299_vm1, %v1565_v33  ;;  %1426 = vmatmul.mubr.msk.bf16.vlgmr.msra.gmra.mrb[0].mxu1 %vm299_vm1, %v1565_v33  ;;  %v332_v18 = vsel %vm306_vm0, %v1414_v11, 0  ;;  %v338_v19 = vsel %vm306_vm0, %v1416_v13, 0  ;;  %v1402_v32 = vcombine.low %v47_v22, %v55_v23  ;;  %v1419_v35 = vcombine.high %v63_v29, %v63_v29 }
  0x12   :  { %462 = vmatpush1.bf16.msra.mxu0 %v1378_v34  ;;  %515 = vmatpush1.bf16.msra.mxu1 %v1380_v37  ;;  %v1404_v34 = vcombine.low %v48_v25, %v56_v26  ;;  %v1418_v36 = vcombine.low %v63_v29, %v63_v29  ;;  %v1421_v37 = vcombine.high %v64_v31, %v64_v31 }
  0x13   :  { %463 = vmatprep.subr.bf16.mxu0 %v1395_v38  ;;  %397 = vmatprep.mubr.bf16.mxu0 %v1475_v3  ;;  %v1420_v38 = vcombine.low %v64_v31, %v64_v31 }
  0x14   :  { %450 = vmatprep.mubr.bf16.mxu1 %v1475_v3  ;;  %516 = vmatprep.subr.bf16.mxu1 %v1397_v40  ;;  %v344_v39 = vsel %vm306_vm0, %v1418_v36, 0 }
  0x15   :  { %v350_v40 = vsel %vm306_vm0, %v1420_v38, 0 }
  0x16   :  { %464 = vmatpush1.bf16.msra.mxu0 %v1394_v42  ;;  %517 = vmatpush1.bf16.msra.mxu1 %v1396_v44 }
  0x17   :  { %1428 = vmatprep.subr.msk.bf16.mxu0 %vm306_vm0, %v1411_v45  ;;  %1431 = vmatprep.subr.msk.bf16.mxu1 %vm306_vm0, %v1413_v48 }
  0x19   :  { %1424 = vmatmul.mubr.msk.bf16.gmra.mrb[4].mxu0 %vm299_vm1, %v1594_v50  ;;  %1427 = vmatmul.mubr.msk.bf16.gmra.mrb[4].mxu1 %vm299_vm1, %v1594_v50 }
  0x1a   :  { %466 = vmatpush1.bf16.msra.mxu0 %v320_v56  ;;  %519 = vmatpush1.bf16.msra.mxu1 %v326_v57 }
  0x1b   :  { %493 = vmatprep.mubr.bf16.mxu0 %v1475_v3  ;;  %546 = vmatprep.mubr.bf16.mxu1 %v1475_v3 }
  0x1c   :  { %567 = vmatprep.subr.bf16.mxu0 %v1383_v58  ;;  %620 = vmatprep.subr.bf16.mxu1 %v1385_v59 }
  0x21   :  { %1429 = vmatmul.mubr.msk.bf16.vlgmr.msra.gmra.mrb[8].mxu0 %vm299_vm1, %v1565_v33  ;;  %1432 = vmatmul.mubr.msk.bf16.vlgmr.msra.gmra.mrb[8].mxu1 %vm299_vm1, %v1565_v33 }
  0x22   :  { %568 = vmatpush1.bf16.msra.mxu0 %v1382_v63  ;;  %621 = vmatpush1.bf16.msra.mxu1 %v1384_v2 }
  0x23   :  { %569 = vmatprep.subr.bf16.mxu0 %v1399_v4  ;;  %503 = vmatprep.mubr.bf16.mxu0 %v1475_v3 }
  0x24   :  { %556 = vmatprep.mubr.bf16.mxu1 %v1475_v3  ;;  %622 = vmatprep.subr.bf16.mxu1 %v1401_v6 }
  0x26   :  { %570 = vmatpush1.bf16.msra.mxu0 %v1398_v8  ;;  %623 = vmatpush1.bf16.msra.mxu1 %v1400_v9 }
  0x27   :  { %1434 = vmatprep.subr.msk.bf16.mxu0 %vm306_vm0, %v1415_v10  ;;  %1437 = vmatprep.subr.msk.bf16.mxu1 %vm306_vm0, %v1417_v12 }
  0x29   :  { %1430 = vmatmul.mubr.msk.bf16.gmra.mrb[12].mxu0 %vm299_vm1, %v1594_v50  ;;  %1433 = vmatmul.mubr.msk.bf16.gmra.mrb[12].mxu1 %vm299_vm1, %v1594_v50 }
  0x2a   :  { %572 = vmatpush1.bf16.msra.mxu0 %v332_v18  ;;  %625 = vmatpush1.bf16.msra.mxu1 %v338_v19 }
  0x2b   :  { %599 = vmatprep.mubr.bf16.mxu0 %v1475_v3  ;;  %652 = vmatprep.mubr.bf16.mxu1 %v1475_v3 }
  0x2c   :  { %673 = vmatprep.subr.bf16.mxu0 %v1387_v20  ;;  %726 = vmatprep.subr.bf16.mxu1 %v1389_v21 }
  0x31   :  { %1435 = vmatmul.mubr.msk.bf16.vlgmr.msra.gmra.mrb[16].mxu0 %vm299_vm1, %v1565_v33  ;;  %1438 = vmatmul.mubr.msk.bf16.vlgmr.msra.gmra.mrb[16].mxu1 %vm299_vm1, %v1565_v33 }
  0x32   :  { %674 = vmatpush1.bf16.msra.mxu0 %v1386_v24  ;;  %727 = vmatpush1.bf16.msra.mxu1 %v1388_v27 }
  0x33   :  { %675 = vmatprep.subr.bf16.mxu0 %v1403_v28  ;;  %609 = vmatprep.mubr.bf16.mxu0 %v1475_v3 }
  0x34   :  { %662 = vmatprep.mubr.bf16.mxu1 %v1475_v3  ;;  %728 = vmatprep.subr.bf16.mxu1 %v1405_v30 }
  0x36   :  { %676 = vmatpush1.bf16.msra.mxu0 %v1402_v32  ;;  %729 = vmatpush1.bf16.msra.mxu1 %v1404_v34 }
  0x37   :  { %1440 = vmatprep.subr.msk.bf16.mxu0 %vm306_vm0, %v1419_v35  ;;  %1443 = vmatprep.subr.msk.bf16.mxu1 %vm306_vm0, %v1421_v37 }
  0x39   :  { %1436 = vmatmul.mubr.msk.bf16.gmra.mrb[20].mxu0 %vm299_vm1, %v1594_v50  ;;  %1439 = vmatmul.mubr.msk.bf16.gmra.mrb[20].mxu1 %vm299_vm1, %v1594_v50 }
  0x3a   :  { %678 = vmatpush1.bf16.msra.mxu0 %v344_v39  ;;  %731 = vmatpush1.bf16.msra.mxu1 %v350_v40 }
  0x3b   :  { %705 = vmatprep.mubr.bf16.mxu0 %v1475_v3  ;;  %758 = vmatprep.mubr.bf16.mxu1 %v1475_v3 }
  0x41   :  { %1441 = vmatmul.mubr.msk.bf16.vlgmr.msra.gmra.mrb[24].mxu0 %vm299_vm1, %v1565_v33  ;;  %1444 = vmatmul.mubr.msk.bf16.vlgmr.msra.gmra.mrb[24].mxu1 %vm299_vm1, %v1565_v33 }
  0x42   :  { %715 = vmatprep.mubr.bf16.mxu0 %v1475_v3  ;;  %768 = vmatprep.mubr.bf16.mxu1 %v1475_v3 }
  0x49   :  { %1442 = vmatmul.mubr.msk.bf16.gmra.mrb[28].mxu0 %vm299_vm1, %v1594_v50  ;;  %1445 = vmatmul.mubr.msk.bf16.gmra.mrb[28].mxu1 %vm299_vm1, %v1594_v50 }
  0x87   :  { %v1714_v41 = vpop.permute.xlu0 %71 }
  0x88   :  { %v1716_v49 = vpop.permute.xlu1 %81 }
  0x8b   :  { %v1718_v51 = vpop.permute.xlu0 %76 }
  0x8c   :  { %v1742_v2 = vpop.permute.xlu1 %86 }
  0xe4   :  { %v389_v42 = vpop.f32.mrb[0].mxu0  ;;  %v442_v44 = vpop.f32.mrb[0].mxu1 }
  0xe5   :  { %v391_v43 = vpop.f32.mrb[1].mxu0  ;;  %v444_v46 = vpop.f32.mrb[1].mxu1  ;;  %v1721_v52 = vadd.f32 %v389_v42, %v1714_v41  ;;  %v1735_v63 = vadd.f32 %v442_v44, %v1714_v41 }
  0xe6   :  { %v393_v45 = vpop.f32.mrb[2].mxu0  ;;  %v446_v48 = vpop.f32.mrb[2].mxu1  ;;  %v1724_v50 = vadd.f32 %v391_v43, %v1714_v41  ;;  %v1752_v8 = vadd.f32 %v444_v46, %v1714_v41 }
  0xe7   :  { %v395_v47 = vpop.f32.mrb[3].mxu0  ;;  %v448_v33 = vpop.f32.mrb[3].mxu1  ;;  %v1727_v57 = vadd.f32 %v393_v45, %v1718_v51  ;;  %v1740_v1 = vadd.f32 %v446_v48, %v1718_v51 }
  0xe8   :  { %v1730_v58 = vadd.f32 %v395_v47, %v1718_v51  ;;  %v779_v62 = vadd.f32 %v1724_v50, %v1721_v52  ;;  %v1771_v23 = vadd.f32 %v448_v33, %v1718_v51 }
  0xea   :  { %v796_v0 = vadd.f32 %v1730_v58, %v1727_v57  ;;  %v780_v7 = vadd.f32 %v779_v62, %v1735_v63 }
  0xec   :  { %v399_v3 = vpop.f32.mrb[4].mxu0  ;;  %v452_v54 = vpop.f32.mrb[4].mxu1  ;;  %v797_v15 = vadd.f32 %v796_v0, %v1740_v1  ;;  %v781_v22 = vadd.f32 %v780_v7, %v1752_v8 }
  0xed   :  { %v401_v53 = vpop.f32.mrb[5].mxu0  ;;  %v454_v56 = vpop.f32.mrb[5].mxu1  ;;  %v1745_v4 = vadd.f32 %v399_v3, %v1716_v49  ;;  %v1767_v20 = vadd.f32 %v452_v54, %v1716_v49 }
  0xee   :  { %v403_v55 = vpop.f32.mrb[6].mxu0  ;;  %v456_v60 = vpop.f32.mrb[6].mxu1  ;;  %v1748_v5 = vadd.f32 %v401_v53, %v1716_v49  ;;  %v798_v27 = vadd.f32 %v797_v15, %v1771_v23  ;;  %v1788_v31 = vadd.f32 %v454_v56, %v1716_v49 }
  0xef   :  { %v405_v59 = vpop.f32.mrb[7].mxu0  ;;  %v458_v61 = vpop.f32.mrb[7].mxu1  ;;  %v1755_v11 = vadd.f32 %v403_v55, %v1742_v2  ;;  %v1779_v26 = vadd.f32 %v456_v60, %v1742_v2 }
  0xf0   :  { %v1758_v12 = vadd.f32 %v405_v59, %v1742_v2  ;;  %v813_v19 = vadd.f32 %v1748_v5, %v1745_v4  ;;  %v1804_v48 = vadd.f32 %v458_v61, %v1742_v2 }
  0xf1   :  { %2693 = vst [vmem:[#allocation2_spill] sm:$0xff] %v1779_v26 }
  0xf2   :  { %v830_v25 = vadd.f32 %v1758_v12, %v1755_v11  ;;  %v814_v30 = vadd.f32 %v813_v19, %v1767_v20  ;;  %2694 = vst [vmem:[#allocation3_spill] sm:$0xff] %v1804_v48 }
  0xf4   :  { %v495_v6 = vpop.f32.mrb[8].mxu0  ;;  %v548_v10 = vpop.f32.mrb[8].mxu1  ;;  %v831_v38 = vadd.f32 %v830_v25, %v1779_v26  ;;  %v815_v47 = vadd.f32 %v814_v30, %v1788_v31 }
  0xf5   :  { %v497_v9 = vpop.f32.mrb[9].mxu0  ;;  %v550_v14 = vpop.f32.mrb[9].mxu1  ;;  %v1762_v16 = vadd.f32 %v495_v6, %v1714_v41  ;;  %v1800_v44 = vadd.f32 %v548_v10, %v1714_v41 }
  0xf6   :  { %v499_v13 = vpop.f32.mrb[10].mxu0  ;;  %v552_v18 = vpop.f32.mrb[10].mxu1  ;;  %v1784_v29 = vadd.f32 %v497_v9, %v1714_v41  ;;  %v832_v54 = vadd.f32 %v831_v38, %v1804_v48  ;;  %v1824_v6 = vadd.f32 %v550_v14, %v1714_v41 }
  0xf7   :  { %v501_v17 = vpop.f32.mrb[11].mxu0  ;;  %v554_v21 = vpop.f32.mrb[11].mxu1  ;;  %v1774_v24 = vadd.f32 %v499_v13, %v1718_v51  ;;  %v782_v28 = vadd.f32 %v781_v22, %v1762_v16  ;;  %v1817_v60 = vadd.f32 %v552_v18, %v1718_v51 }
  0xf8   :  { %v1792_v35 = vadd.f32 %v501_v17, %v1718_v51  ;;  %v1836_v25 = vadd.f32 %v554_v21, %v1718_v51 }
  0xf9   :  { %v799_v34 = vadd.f32 %v798_v27, %v1774_v24  ;;  %v783_v43 = vadd.f32 %v782_v28, %v1784_v29 }
  0xfb   :  { %v800_v53 = vadd.f32 %v799_v34, %v1792_v35  ;;  %v784_v59 = vadd.f32 %v783_v43, %v1800_v44 }
  0xfc   :  { %v505_v32 = vpop.f32.mrb[12].mxu0  ;;  %v558_v37 = vpop.f32.mrb[12].mxu1 }
  0xfd   :  { %v507_v36 = vpop.f32.mrb[13].mxu0  ;;  %v1796_v39 = vadd.f32 %v505_v32, %v1716_v49  ;;  %v560_v42 = vpop.f32.mrb[13].mxu1  ;;  %v801_v7 = vadd.f32 %v800_v53, %v1817_v60  ;;  %v1832_v17 = vadd.f32 %v558_v37, %v1716_v49  ;;  %v785_v22 = vadd.f32 %v784_v59, %v1824_v6 }
  0xfe   :  { %v509_v40 = vpop.f32.mrb[14].mxu0  ;;  %v562_v46 = vpop.f32.mrb[14].mxu1  ;;  %v1813_v56 = vadd.f32 %v507_v36, %v1716_v49 }
  0xff   :  { %v511_v45 = vpop.f32.mrb[15].mxu0  ;;  %v1807_v33 = vadd.f32 %v509_v40, %v1742_v2  ;;  %v564_v3 = vpop.f32.mrb[15].mxu1  ;;  %v816_v55 = vadd.f32 %v815_v47, %v1796_v39  ;;  %v802_v34 = vadd.f32 %v801_v7, %v1836_v25  ;;  %v1849_v21 = vadd.f32 %v562_v46, %v1742_v2 }
 0x100   :  { %v1821_v62 = vadd.f32 %v511_v45, %v1742_v2  ;;  %v1856_v45 = vadd.f32 %v560_v42, %v1716_v49 }
 0x101   :  { %2695 = vst [vmem:[#allocation4_spill] sm:$0xff] %v1807_v33  ;;  %v833_v61 = vadd.f32 %v832_v54, %v1807_v33  ;;  %v817_v15 = vadd.f32 %v816_v55, %v1813_v56  ;;  %2697 = vst [vmem:[#allocation6_spill] sm:$0xff] %v1849_v21 }
 0x102   :  { %2696 = vst [vmem:[#allocation5_spill] sm:$0xff] %v1821_v62 }
 0x103   :  { %v834_v30 = vadd.f32 %v833_v61, %v1821_v62  ;;  %v818_v38 = vadd.f32 %v817_v15, %v1832_v17 }
 0x104   :  { %v601_v0 = vpop.f32.mrb[16].mxu0  ;;  %v654_v10 = vpop.f32.mrb[16].mxu1 }
 0x105   :  { %v1828_v9 = vadd.f32 %v601_v0, %v1714_v41  ;;  %v603_v13 = vpop.f32.mrb[17].mxu0  ;;  %v656_v18 = vpop.f32.mrb[17].mxu1  ;;  %v835_v47 = vadd.f32 %v834_v30, %v1849_v21  ;;  %v819_v46 = vadd.f32 %v818_v38, %v1856_v45  ;;  %v1865_v0 = vadd.f32 %v564_v3, %v1742_v2 }
 0x106   :  { %v605_v19 = vpop.f32.mrb[18].mxu0  ;;  %v658_v27 = vpop.f32.mrb[18].mxu1  ;;  %v1845_v37 = vadd.f32 %v603_v13, %v1714_v41  ;;  %v1868_v42 = vadd.f32 %v654_v10, %v1714_v41 }
 0x107   :  { %v1839_v14 = vadd.f32 %v605_v19, %v1718_v51  ;;  %v607_v28 = vpop.f32.mrb[19].mxu0  ;;  %v660_v32 = vpop.f32.mrb[19].mxu1  ;;  %v786_v36 = vadd.f32 %v785_v22, %v1828_v9  ;;  %2698 = vst [vmem:[#allocation7_spill] sm:$0xff] %v1865_v0  ;;  %v836_v30 = vadd.f32 %v835_v47, %v1865_v0  ;;  %v1881_v10 = vadd.f32 %v658_v27, %v1718_v51 }
 0x108   :  { %v1853_v43 = vadd.f32 %v607_v28, %v1718_v51 }
 0x109   :  { %v803_v40 = vadd.f32 %v802_v34, %v1839_v14  ;;  %v787_v54 = vadd.f32 %v786_v36, %v1845_v37 }
 0x10b   :  { %v804_v15 = vadd.f32 %v803_v40, %v1853_v43  ;;  %v788_v38 = vadd.f32 %v787_v54, %v1868_v42  ;;  %v1894_v54 = vadd.f32 %v660_v32, %v1718_v51 }
 0x10c   :  { %v611_v53 = vpop.f32.mrb[20].mxu0  ;;  %v664_v59 = vpop.f32.mrb[20].mxu1 }
 0x10d   :  { %v1861_v55 = vadd.f32 %v611_v53, %v1716_v49  ;;  %v613_v61 = vpop.f32.mrb[21].mxu0  ;;  %v666_v7 = vpop.f32.mrb[21].mxu1  ;;  %v805_v47 = vadd.f32 %v804_v15, %v1881_v10 }
 0x10e   :  { %v615_v13 = vpop.f32.mrb[22].mxu0  ;;  %v668_v22 = vpop.f32.mrb[22].mxu1  ;;  %v1877_v36 = vadd.f32 %v613_v61, %v1716_v49 }
 0x10f   :  { %v1872_v19 = vadd.f32 %v615_v13, %v1742_v2  ;;  %v617_v28 = vpop.f32.mrb[23].mxu0  ;;  %v820_v34 = vadd.f32 %v819_v46, %v1861_v55  ;;  %v670_v3 = vpop.f32.mrb[23].mxu1  ;;  %v1888_v13 = vadd.f32 %v656_v18, %v1714_v41 }
 0x110   :  { %2700 = vst [vmem:[#allocation9_spill] sm:$0xff] %v1877_v36  ;;  %v1885_v53 = vadd.f32 %v617_v28, %v1742_v2  ;;  %v1900_v28 = vadd.f32 %v664_v59, %v1716_v49  ;;  %v1913_v59 = vadd.f32 %v668_v22, %v1742_v2 }
 0x111   :  { %2699 = vst [vmem:[#allocation8_spill] sm:$0xff] %v1872_v19  ;;  %v837_v40 = vadd.f32 %v836_v30, %v1872_v19  ;;  %v821_v46 = vadd.f32 %v820_v34, %v1877_v36  ;;  %v789_v0 = vadd.f32 %v788_v38, %v1888_v13  ;;  %v806_v38 = vadd.f32 %v805_v47, %v1894_v54 }
 0x112   :  { %2701 = vst [vmem:[#allocation10_spill] sm:$0xff] %v1885_v53  ;;  %2702 = vst [vmem:[#allocation11_spill] sm:$0xff] %v1900_v28 }
 0x113   :  { %v838_v18 = vadd.f32 %v837_v40, %v1885_v53  ;;  %v822_v48 = vadd.f32 %v821_v46, %v1900_v28  ;;  %2703 = vst [vmem:[#allocation12_spill] sm:$0xff] %v1913_v59 }
 0x114   :  { %v707_v61 = vpop.f32.mrb[24].mxu0  ;;  %v760_v30 = vpop.f32.mrb[24].mxu1 }
 0x115   :  { %v1897_v27 = vadd.f32 %v707_v61, %v1714_v41  ;;  %v709_v19 = vpop.f32.mrb[25].mxu0  ;;  %v762_v34 = vpop.f32.mrb[25].mxu1  ;;  %v1919_v53 = vadd.f32 %v760_v30, %v1714_v41  ;;  %v839_v36 = vadd.f32 %v838_v18, %v1913_v59 }
 0x116   :  { %v1904_v15 = vadd.f32 %v709_v19, %v1714_v41  ;;  %v711_v21 = vpop.f32.mrb[26].mxu0  ;;  %v764_v61 = vpop.f32.mrb[26].mxu1  ;;  %v1928_v46 = vadd.f32 %v762_v34, %v1714_v41 }
 0x117   :  { %v790_v32 = vadd.f32 %v789_v0, %v1897_v27  ;;  %v1909_v62 = vadd.f32 %v711_v21, %v1718_v51  ;;  %v713_v33 = vpop.f32.mrb[27].mxu0  ;;  %v766_v19 = vpop.f32.mrb[27].mxu1  ;;  %v1924_v21 = vadd.f32 %v666_v7, %v1716_v49  ;;  %v1931_v22 = vadd.f32 %v764_v61, %v1718_v51 }
 0x118   :  { %v1916_v40 = vadd.f32 %v713_v33, %v1718_v51  ;;  %v1940_v7 = vadd.f32 %v766_v19, %v1718_v51 }
 0x119   :  { %v791_v47 = vadd.f32 %v790_v32, %v1904_v15  ;;  %v807_v0 = vadd.f32 %v806_v38, %v1909_v62  ;;  %2704 = vst [vmem:[#allocation13_spill] sm:$0xff] %v1924_v21  ;;  %2705 = vst [vmem:[#allocation14_spill] sm:$0xff] %v1931_v22  ;;  %v823_v28 = vadd.f32 %v822_v48, %v1924_v21 }
 0x11a   :  { %v1937_v32 = vadd.f32 %v670_v3, %v1742_v2 }
 0x11b   :  { %v808_v33 = vadd.f32 %v807_v0, %v1916_v40  ;;  %v792_v30 = vadd.f32 %v791_v47, %v1919_v53 }
 0x11c   :  { %2706 = vst [vmem:[#allocation15_spill] sm:$0xff] %v1937_v32  ;;  %v717_v38 = vpop.f32.mrb[28].mxu0  ;;  %v770_v41 = vpop.f32.mrb[28].mxu1  ;;  %v840_v3 = vadd.f32 %v839_v36, %v1937_v32 }
 0x11d   :  { %v1943_v18 = vadd.f32 %v717_v38, %v1716_v49  ;;  %v719_v34 = vpop.f32.mrb[29].mxu0  ;;  %v793_v61 = vadd.f32 %v792_v30, %v1928_v46  ;;  %v809_v0 = vadd.f32 %v808_v33, %v1931_v22  ;;  %v772_v48 = vpop.f32.mrb[29].mxu1 }
 0x11e   :  { %v1948_v47 = vadd.f32 %v719_v34, %v1716_v49  ;;  %v721_v59 = vpop.f32.mrb[30].mxu0  ;;  %v774_v19 = vpop.f32.mrb[30].mxu1  ;;  %v1960_v34 = vadd.f32 %v770_v41, %v1716_v49 }
 0x11f   :  { %v824_v21 = vadd.f32 %v823_v28, %v1943_v18  ;;  %v1953_v51 = vadd.f32 %v721_v59, %v1742_v2  ;;  %v723_v38 = vpop.f32.mrb[31].mxu0  ;;  %794 = vadd.xlane.f32.xlu0 %v793_v61  ;;  %v810_v26 = vadd.f32 %v809_v0, %v1940_v7  ;;  %v776_v33 = vpop.f32.mrb[31].mxu1  ;;  %v1965_v28 = vadd.f32 %v772_v48, %v1716_v49 }
 0x120   :  { %v1957_v30 = vadd.f32 %v723_v38, %v1742_v2  ;;  %v1968_v59 = vadd.f32 %v774_v19, %v1742_v2  ;;  %v1975_v32 = vadd.f32 %v776_v33, %v1742_v2 }
 0x121   :  { %v825_v22 = vadd.f32 %v824_v21, %v1948_v47  ;;  %v841_v36 = vadd.f32 %v840_v3, %v1953_v51  ;;  %811 = vadd.xlane.f32.xlu1 %v810_v26 }
 0x123   :  { %v842_v61 = vadd.f32 %v841_v36, %v1957_v30  ;;  %v826_v0 = vadd.f32 %v825_v22, %v1960_v34 }
 0x125   :  { %v827_v38 = vadd.f32 %v826_v0, %v1965_v28  ;;  %v843_v41 = vadd.f32 %v842_v61, %v1968_v59 }
 0x127   :  { %828 = vadd.xlane.f32.xlu0 %v827_v38  ;;  %v844_v26 = vadd.f32 %v843_v41, %v1975_v32 }
 0x12b   :  { %845 = vadd.xlane.f32.xlu0 %v844_v26 }
 0x1ac   :  { %v795_v49 = vpop.xlane.xlu0 %794 }
 0x1ad   :  { %v848_v21 = vmul.f32 0.00048828125, %v795_v49 }
 0x1ae   :  { %v812_v22 = vpop.xlane.xlu1 %811 }
 0x1af   :  { %v1979_v48 = vsub.f32 %v1721_v52, %v848_v21  ;;  %v1982_v3 = vsub.f32 %v1724_v50, %v848_v21  ;;  %v1985_v19 = vsub.f32 %v1735_v63, %v848_v21  ;;  %v1991_v36 = vmul.f32 0.00048828125, %v812_v22 }
 0x1b0   :  { %v1994_v61 = vsub.f32 %v1752_v8, %v848_v21  ;;  %v1997_v52 = vsub.f32 %v1762_v16, %v848_v21  ;;  %v2002_v63 = vsub.f32 %v1784_v29, %v848_v21  ;;  %v2015_v16 = vsub.f32 %v1800_v44, %v848_v21 }
 0x1b1   :  { %v916_v2 = vmul.f32 %v1979_v48, %v1979_v48  ;;  %v917_v33 = vmul.f32 %v1982_v3, %v1982_v3  ;;  %v918_v50 = vmul.f32 %v1985_v19, %v1985_v19  ;;  %v2008_v26 = vsub.f32 %v1727_v57, %v1991_v36 }
 0x1b2   :  { %v919_v38 = vmul.f32 %v1994_v61, %v1994_v61  ;;  %v2012_v8 = vsub.f32 %v1730_v58, %v1991_v36  ;;  %v920_v49 = vmul.f32 %v1997_v52, %v1997_v52  ;;  %v2020_v22 = vsub.f32 %v1824_v6, %v848_v21 }
 0x1b3   :  { %v980_v0 = vadd.f32 %v917_v33, %v916_v2  ;;  %2707 = vst [vmem:[#allocation16_spill] sm:$0xff] %v2008_v26  ;;  %v921_v2 = vmul.f32 %v2002_v63, %v2002_v63  ;;  %v932_v58 = vmul.f32 %v2008_v26, %v2008_v26  ;;  %v922_v6 = vmul.f32 %v2015_v16, %v2015_v16 }
 0x1b4   :  { %2708 = vst [vmem:[#allocation17_spill] sm:$0xff] %v2012_v8  ;;  %v829_v33 = vpop.xlane.xlu0 %828  ;;  %v933_v44 = vmul.f32 %v2012_v8, %v2012_v8  ;;  %v2053_v26 = vsub.f32 %v1774_v24, %v1991_v36  ;;  %v2070_v24 = vsub.f32 %v1792_v35, %v1991_v36 }
 0x1b5   :  { %v981_v41 = vadd.f32 %v980_v0, %v918_v50  ;;  %v2026_v50 = vsub.f32 %v1740_v1, %v1991_v36  ;;  %v2033_v0 = vsub.f32 %v1828_v9, %v848_v21  ;;  %v2044_v1 = vsub.f32 %v1845_v37, %v848_v21 }
 0x1b6   :  { %v923_v9 = vmul.f32 %v2020_v22, %v2020_v22  ;;  %2709 = vst [vmem:[#allocation18_spill] sm:$0xff] %v2053_v26  ;;  %v2061_v37 = vsub.f32 %v1897_v27, %v848_v21  ;;  %2710 = vst [vmem:[#allocation19_spill] sm:$0xff] %v2070_v24 }
 0x1b7   :  { %v982_v29 = vadd.f32 %v981_v41, %v919_v38  ;;  %v2039_v41 = vsub.f32 %v1771_v23, %v1991_v36  ;;  %v934_v23 = vmul.f32 %v2026_v50, %v2026_v50  ;;  %v925_v27 = vmul.f32 %v2044_v1, %v2044_v1 }
 0x1b9   :  { %v983_v57 = vadd.f32 %v982_v29, %v920_v49  ;;  %v2041_v49 = vmul.f32 0.00048828125, %v829_v33  ;;  %v2047_v29 = vsub.f32 %v1868_v42, %v848_v21  ;;  %v2058_v33 = vsub.f32 %v1888_v13, %v848_v21 }
 0x1ba   :  { %v2064_v42 = vsub.f32 %v1904_v15, %v848_v21  ;;  %v2075_v13 = vsub.f32 %v1919_v53, %v848_v21  ;;  %v936_v53 = vmul.f32 %v2053_v26, %v2053_v26 }
 0x1bb   :  { %v984_v38 = vadd.f32 %v983_v57, %v921_v2  ;;  %v997_v2 = vadd.f32 %v933_v44, %v932_v58  ;;  %v924_v57 = vmul.f32 %v2033_v0, %v2033_v0  ;;  %v935_v58 = vmul.f32 %v2039_v41, %v2039_v41 }
 0x1bc   :  { %v2081_v15 = vsub.f32 %v1745_v4, %v2041_v49  ;;  %v926_v4 = vmul.f32 %v2047_v29, %v2047_v29 }
 0x1bd   :  { %v985_v8 = vadd.f32 %v984_v38, %v922_v6  ;;  %v998_v44 = vadd.f32 %v997_v2, %v934_v23  ;;  %v2089_v38 = vsub.f32 %v1817_v60, %v1991_v36  ;;  %v2094_v23 = vsub.f32 %v1928_v46, %v848_v21 }
 0x1be   :  { %2711 = vst [vmem:[#allocation20_spill] sm:$0xff] %v2081_v15  ;;  %v927_v2 = vmul.f32 %v2058_v33, %v2058_v33  ;;  %v2104_v60 = vsub.f32 %v1836_v25, %v1991_v36  ;;  %v929_v21 = vmul.f32 %v2064_v42, %v2064_v42  ;;  %v948_v26 = vmul.f32 %v2081_v15, %v2081_v15 }
 0x1bf   :  { %v986_v6 = vadd.f32 %v985_v8, %v923_v9  ;;  %v2085_v8 = vsub.f32 %v1748_v5, %v2041_v49  ;;  %v999_v9 = vadd.f32 %v998_v44, %v935_v58  ;;  %v928_v5 = vmul.f32 %v2061_v37, %v2061_v37 }
 0x1c0   :  { %v937_v58 = vmul.f32 %v2070_v24, %v2070_v24  ;;  %v2112_v44 = vsub.f32 %v1767_v20, %v2041_v49  ;;  %v2120_v25 = vsub.f32 %v1839_v14, %v1991_v36  ;;  %v930_v20 = vmul.f32 %v2075_v13, %v2075_v13 }
 0x1c1   :  { %2712 = vst [vmem:[#allocation21_spill] sm:$0xff] %v2085_v8  ;;  %v987_v35 = vadd.f32 %v986_v6, %v924_v57  ;;  %v846_v57 = vpop.xlane.xlu0 %845  ;;  %v1000_v46 = vadd.f32 %v999_v9, %v936_v53  ;;  %v938_v53 = vmul.f32 %v2089_v38, %v2089_v38  ;;  %v931_v15 = vmul.f32 %v2094_v23, %v2094_v23 }
 0x1c2   :  { %v2124_v24 = vmul.f32 0.00048828125, %v846_v57  ;;  %v2136_v14 = vsub.f32 %v1853_v43, %v1991_v36  ;;  %v2152_v43 = vsub.f32 %v1894_v54, %v1991_v36 }
 0x1c3   :  { %v988_v6 = vadd.f32 %v987_v35, %v925_v27  ;;  %v949_v27 = vmul.f32 %v2085_v8, %v2085_v8  ;;  %v1001_v9 = vadd.f32 %v1000_v46, %v937_v58  ;;  %v2132_v8 = vsub.f32 %v1788_v31, %v2041_v49 }
 0x1c4   :  { %v2142_v58 = vsub.f32 %v1881_v10, %v1991_v36  ;;  %v2146_v46 = vsub.f32 %v1796_v39, %v2041_v49  ;;  %v950_v31 = vmul.f32 %v2112_v44, %v2112_v44  ;;  %v2158_v10 = vsub.f32 %v1909_v62, %v1991_v36 }
 0x1c5   :  { %v989_v35 = vadd.f32 %v988_v6, %v926_v4  ;;  %v939_v6 = vmul.f32 %v2104_v60, %v2104_v60  ;;  %v1002_v57 = vadd.f32 %v1001_v9, %v938_v53  ;;  %v940_v53 = vmul.f32 %v2120_v25, %v2120_v25 }
 0x1c6   :  { %v2162_v39 = vsub.f32 %v1813_v56, %v2041_v49  ;;  %v941_v54 = vmul.f32 %v2136_v14, %v2136_v14  ;;  %v952_v62 = vmul.f32 %v2146_v46, %v2146_v46  ;;  %v2176_v56 = vsub.f32 %v1755_v11, %v2124_v24 }
 0x1c7   :  { %v990_v4 = vadd.f32 %v989_v35, %v927_v2  ;;  %v1014_v2 = vadd.f32 %v949_v27, %v948_v26  ;;  %v1003_v9 = vadd.f32 %v1002_v57, %v939_v6  ;;  %v951_v26 = vmul.f32 %v2132_v8, %v2132_v8 }
 0x1c8   :  { %v2170_v6 = vsub.f32 %v1832_v17, %v2041_v49  ;;  %2713 = vst [vmem:[#allocation22_spill] sm:$0xff] %v2176_v56  ;;  %v942_v17 = vmul.f32 %v2142_v58, %v2142_v58  ;;  %v2192_v11 = vsub.f32 %v1856_v45, %v2041_v49  ;;  %v964_v45 = vmul.f32 %v2176_v56, %v2176_v56  ;;  %v2725_v56 = vld [vmem:[#allocation4_spill] sm:$0xff] }
 0x1c9   :  { %v991_v35 = vadd.f32 %v990_v4, %v928_v5  ;;  %v1015_v5 = vadd.f32 %v1014_v2, %v950_v31  ;;  %v1004_v4 = vadd.f32 %v1003_v9, %v940_v53  ;;  %v2180_v31 = vsub.f32 %v1758_v12, %v2124_v24 }
 0x1ca   :  { %v2184_v2 = vsub.f32 %v1916_v40, %v1991_v36  ;;  %v943_v53 = vmul.f32 %v2152_v43, %v2152_v43  ;;  %2715 = vst [vmem:[#allocation24_spill] sm:$0xff] %v2192_v11  ;;  %v953_v12 = vmul.f32 %v2162_v39, %v2162_v39  ;;  %v2198_v40 = vsub.f32 %v1861_v55, %v2041_v49 }
 0x1cb   :  { %v992_v27 = vadd.f32 %v991_v35, %v929_v21  ;;  %v1016_v57 = vadd.f32 %v1015_v5, %v951_v26  ;;  %2714 = vst [vmem:[#allocation23_spill] sm:$0xff] %v2180_v31  ;;  %v1005_v35 = vadd.f32 %v1004_v4, %v941_v54  ;;  %v954_v5 = vmul.f32 %v2170_v6, %v2170_v6  ;;  %v2717_v54 = vld [vmem:[#allocation2_spill] sm:$0xff] }
 0x1cc   :  { %2716 = vst [vmem:[#allocation25_spill] sm:$0xff] %v2198_v40  ;;  %v2204_v4 = vsub.f32 %v2717_v54, %v2124_v24  ;;  %v944_v55 = vmul.f32 %v2158_v10, %v2158_v10  ;;  %v2721_v54 = vld [vmem:[#allocation3_spill] sm:$0xff] }
 0x1cd   :  { %v993_v21 = vadd.f32 %v992_v27, %v930_v20  ;;  %v1017_v9 = vadd.f32 %v1016_v57, %v952_v62  ;;  %v1006_v26 = vadd.f32 %v1005_v35, %v942_v17  ;;  %v965_v62 = vmul.f32 %v2180_v31, %v2180_v31  ;;  %v2720_v17 = vld [vmem:[#allocation9_spill] sm:$0xff] }
 0x1ce   :  { %2718 = vst [vmem:[#allocation2_spill] sm:$0xff] %v2204_v4  ;;  %v2218_v35 = vsub.f32 %v2720_v17, %v2041_v49  ;;  %v945_v31 = vmul.f32 %v2184_v2, %v2184_v2 }
 0x1cf   :  { %v994_v20 = vadd.f32 %v993_v21, %v931_v15  ;;  %v1018_v27 = vadd.f32 %v1017_v9, %v953_v12  ;;  %v2719_v15 = vld [vmem:[#allocation14_spill] sm:$0xff]  ;;  %v1007_v21 = vadd.f32 %v1006_v26, %v943_v53  ;;  %v2222_v12 = vsub.f32 %v1940_v7, %v1991_v36  ;;  %v2723_v26 = vld [vmem:[#allocation11_spill] sm:$0xff] }
 0x1d0   :  { %v2212_v57 = vsub.f32 %v2719_v15, %v1991_v36  ;;  %v955_v9 = vmul.f32 %v2192_v11, %v2192_v11  ;;  %v2228_v15 = vsub.f32 %v2721_v54, %v2124_v24  ;;  %v2234_v17 = vsub.f32 %v2723_v26, %v2041_v49 }
 0x1d1   :  { %995 = vadd.xlane.f32.xlu1 %v994_v20  ;;  %v1019_v20 = vadd.f32 %v1018_v27, %v954_v5  ;;  %v1008_v53 = vadd.f32 %v1007_v21, %v944_v55  ;;  %v956_v7 = vmul.f32 %v2198_v40, %v2198_v40  ;;  %v2240_v11 = vsub.f32 %v2725_v56, %v2124_v24  ;;  %v2726_v21 = vld [vmem:[#allocation13_spill] sm:$0xff] }
 0x1d2   :  { %2722 = vst [vmem:[#allocation14_spill] sm:$0xff] %v2228_v15  ;;  %2724 = vst [vmem:[#allocation9_spill] sm:$0xff] %v2234_v17  ;;  %v966_v5 = vmul.f32 %v2204_v4, %v2204_v4  ;;  %v1031_v27 = vadd.f32 %v965_v62, %v964_v45  ;;  %v946_v54 = vmul.f32 %v2212_v57, %v2212_v57 }
 0x1d3   :  { %v1020_v36 = vadd.f32 %v1019_v20, %v955_v9  ;;  %v1009_v55 = vadd.f32 %v1008_v53, %v945_v31  ;;  %v2248_v26 = vsub.f32 %v2726_v21, %v2041_v49  ;;  %v957_v40 = vmul.f32 %v2218_v35, %v2218_v35  ;;  %v2727_v20 = vld [vmem:[#allocation5_spill] sm:$0xff] }
 0x1d4   :  { %v2254_v56 = vsub.f32 %v2727_v20, %v2124_v24  ;;  %v967_v4 = vmul.f32 %v2228_v15, %v2228_v15  ;;  %v1032_v45 = vadd.f32 %v1031_v27, %v966_v5  ;;  %v947_v62 = vmul.f32 %v2222_v12, %v2222_v12 }
 0x1d5   :  { %v1021_v9 = vadd.f32 %v1020_v36, %v956_v7  ;;  %v1010_v31 = vadd.f32 %v1009_v55, %v946_v54  ;;  %v2262_v53 = vsub.f32 %v1943_v18, %v2041_v49  ;;  %v958_v21 = vmul.f32 %v2234_v17, %v2234_v17  ;;  %v2728_v36 = vld [vmem:[#allocation6_spill] sm:$0xff]  ;;  %v2730_v17 = vld [vmem:[#allocation7_spill] sm:$0xff] }
 0x1d6   :  { %v2268_v20 = vsub.f32 %v2728_v36, %v2124_v24  ;;  %v968_v15 = vmul.f32 %v2240_v11, %v2240_v11  ;;  %v1033_v5 = vadd.f32 %v1032_v45, %v967_v4  ;;  %v2274_v54 = vsub.f32 %v1948_v47, %v2041_v49 }
 0x1d7   :  { %v1022_v7 = vadd.f32 %v1021_v9, %v957_v40  ;;  %v1011_v27 = vadd.f32 %v1010_v31, %v947_v62  ;;  %v959_v18 = vmul.f32 %v2248_v26, %v2248_v26  ;;  %v2280_v40 = vsub.f32 %v2730_v17, %v2124_v24  ;;  %v2732_v62 = vld [vmem:[#allocation8_spill] sm:$0xff] }
 0x1d8   :  { %2729 = vst [vmem:[#allocation3_spill] sm:$0xff] %v2268_v20  ;;  %v969_v9 = vmul.f32 %v2254_v56, %v2254_v56  ;;  %v1034_v36 = vadd.f32 %v1033_v5, %v968_v15  ;;  %v2286_v4 = vsub.f32 %v1960_v34, %v2041_v49  ;;  %v960_v47 = vmul.f32 %v2262_v53, %v2262_v53  ;;  %v2734_v5 = vld [vmem:[#allocation10_spill] sm:$0xff] }
 0x1d9   :  { %v1023_v55 = vadd.f32 %v1022_v7, %v958_v21  ;;  %2731 = vst [vmem:[#allocation11_spill] sm:$0xff] %v2280_v40  ;;  %1012 = vadd.xlane.f32.xlu0 %v1011_v27  ;;  %v2292_v31 = vsub.f32 %v2732_v62, %v2124_v24  ;;  %v970_v17 = vmul.f32 %v2268_v20, %v2268_v20  ;;  %v2738_v20 = vld [vmem:[#allocation15_spill] sm:$0xff] }
 0x1da   :  { %v1035_v21 = vadd.f32 %v1034_v36, %v969_v9  ;;  %v2298_v15 = vsub.f32 %v1965_v28, %v2041_v49  ;;  %v961_v34 = vmul.f32 %v2274_v54, %v2274_v54  ;;  %v2304_v27 = vsub.f32 %v2734_v5, %v2124_v24  ;;  %v2736_v36 = vld [vmem:[#allocation12_spill] sm:$0xff] }
 0x1db   :  { %v1024_v45 = vadd.f32 %v1023_v55, %v959_v18  ;;  %2733 = vst [vmem:[#allocation4_spill] sm:$0xff] %v2292_v31  ;;  %v971_v18 = vmul.f32 %v2280_v40, %v2280_v40  ;;  %v962_v62 = vmul.f32 %v2286_v4, %v2286_v4  ;;  %v2312_v28 = vsub.f32 %v2736_v36, %v2124_v24 }
 0x1dc   :  { %2735 = vst [vmem:[#allocation13_spill] sm:$0xff] %v2304_v27  ;;  %v1036_v55 = vadd.f32 %v1035_v21, %v970_v17  ;;  %v972_v49 = vmul.f32 %v2292_v31, %v2292_v31  ;;  %v2320_v40 = vsub.f32 %v2738_v20, %v2124_v24  ;;  %v973_v17 = vmul.f32 %v2304_v27, %v2304_v27 }
 0x1dd   :  { %v1025_v7 = vadd.f32 %v1024_v45, %v960_v47  ;;  %2737 = vst [vmem:[#allocation5_spill] sm:$0xff] %v2312_v28  ;;  %v963_v45 = vmul.f32 %v2298_v15, %v2298_v15  ;;  %v2338_v36 = vsub.f32 %v1968_v59, %v2124_v24 }
 0x1de   :  { %v1037_v47 = vadd.f32 %v1036_v55, %v971_v18  ;;  %2739 = vst [vmem:[#allocation6_spill] sm:$0xff] %v2320_v40  ;;  %v974_v18 = vmul.f32 %v2312_v28, %v2312_v28  ;;  %v975_v20 = vmul.f32 %v2320_v40, %v2320_v40 }
 0x1df   :  { %v1026_v9 = vadd.f32 %v1025_v7, %v961_v34  ;;  %v2326_v7 = vsub.f32 %v1953_v51, %v2124_v24  ;;  %2742 = vst [vmem:[#allocation10_spill] sm:$0xff] %v2338_v36 }
 0x1e0   :  { %v1038_v21 = vadd.f32 %v1037_v47, %v972_v49  ;;  %v2344_v47 = vsub.f32 %v1975_v32, %v2124_v24  ;;  %v1152_v32 = vld [vmem:[%s2653_s4] sm:$0xff] }
 0x1e1   :  { %v1027_v5 = vadd.f32 %v1026_v9, %v962_v62  ;;  %2740 = vst [vmem:[#allocation7_spill] sm:$0xff] %v2326_v7  ;;  %v2332_v62 = vsub.f32 %v1957_v30, %v2124_v24  ;;  %v976_v51 = vmul.f32 %v2326_v7, %v2326_v7 }
 0x1e2   :  { %v1039_v55 = vadd.f32 %v1038_v21, %v973_v17  ;;  %2743 = vst [vmem:[#allocation12_spill] sm:$0xff] %v2344_v47  ;;  %v979_v59 = vmul.f32 %v2344_v47, %v2344_v47 }
 0x1e3   :  { %v1028_v34 = vadd.f32 %v1027_v5, %v963_v45  ;;  %2741 = vst [vmem:[#allocation8_spill] sm:$0xff] %v2332_v62  ;;  %v977_v30 = vmul.f32 %v2332_v62, %v2332_v62  ;;  %v978_v5 = vmul.f32 %v2338_v36, %v2338_v36 }
 0x1e4   :  { %v1040_v9 = vadd.f32 %v1039_v55, %v974_v18  ;;  %v1153_v18 = vld [vmem:[%s2653_s4 + $0x8] sm:$0xff] }
 0x1e5   :  { %1029 = vadd.xlane.f32.xlu1 %v1028_v34 }
 0x1e6   :  { %v1041_v49 = vadd.f32 %v1040_v9, %v975_v20 }
 0x1e8   :  { %v1042_v45 = vadd.f32 %v1041_v49, %v976_v51 }
 0x1ea   :  { %v1043_v17 = vadd.f32 %v1042_v45, %v977_v30  ;;  %v1052_v30 = vld [vmem:[%s2654_s3] sm:$0xff] }
 0x1ec   :  { %v1044_v21 = vadd.f32 %v1043_v17, %v978_v5 }
 0x1ee   :  { %v1045_v34 = vadd.f32 %v1044_v21, %v979_v59  ;;  %v1053_v21 = vld [vmem:[%s2654_s3 + $0x8] sm:$0xff] }
 0x1f0   :  { %1046 = vadd.xlane.f32.xlu0 %v1045_v34 }
 0x1f6   :  { %1163 = vperm.xlu1 %1448, %v1153_v18  }
 0x206   :  { %1158 = vperm.xlu0 %1447, %v1152_v32  }
 0x25e   :  { %v996_v24 = vpop.xlane.xlu1 %995 }
 0x25f   :  { %v1048_v55 = vmul.f32 0.00048828125, %v996_v24  ;;  %v1154_v24 = vld [vmem:[%s2653_s4 + $0x10] sm:$0xff] }
 0x261   :  { %v1056_v20 = vadd.f32 1e-05, %v1048_v55 }
 0x263   :  { %1467 = vrsqrt.f32 %v1056_v20 }
 0x266   :  { %v1013_v9 = vpop.xlane.xlu0 %1012 }
 0x267   :  { %v1049_v51 = vmul.f32 0.00048828125, %v1013_v9  ;;  %v1054_v9 = vld [vmem:[%s2654_s3 + $0x10] sm:$0xff] }
 0x269   :  { %v1057_v49 = vadd.f32 1e-05, %v1049_v51 }
 0x26b   :  { %1469 = vrsqrt.f32 %v1057_v49 }
 0x26d   :  { %v1468_v45 = vpop.eup %1467 }
 0x26e   :  { %v1064_v5 = vmul.f32 %v1468_v45, %v1052_v30  ;;  %v1055_v45 = vld [vmem:[%s2654_s3 + $0x18] sm:$0xff] }
 0x270   :  { %1070 = vperm.xlu1 %1448, %v1064_v5  }
 0x272   :  { %v1030_v17 = vpop.xlane.xlu1 %1029 }
 0x273   :  { %v1050_v59 = vmul.f32 0.00048828125, %v1030_v17 }
 0x275   :  { %v1058_v34 = vadd.f32 1e-05, %v1050_v59  ;;  %v1470_v18 = vpop.eup %1469  ;;  %v1155_v59 = vld [vmem:[%s2653_s4 + $0x18] sm:$0xff] }
 0x276   :  { %v1065_v32 = vmul.f32 %v1470_v18, %v1053_v21  ;;  %v2376_v21 = vpop.permute.xlu1 %1163 }
 0x277   :  { %1471 = vrsqrt.f32 %v1058_v34 }
 0x278   :  { %1075 = vperm.xlu0 %1447, %v1065_v32  }
 0x27c   :  { %1168 = vperm.xlu0 %1447, %v1154_v24  }
 0x27d   :  { %v1047_v55 = vpop.xlane.xlu0 %1046 }
 0x27e   :  { %v1051_v20 = vmul.f32 0.00048828125, %v1047_v55 }
 0x280   :  { %v1059_v49 = vadd.f32 1e-05, %v1051_v20 }
 0x281   :  { %v1472_v51 = vpop.eup %1471 }
 0x282   :  { %v1066_v30 = vmul.f32 %v1472_v51, %v1054_v9  ;;  %1473 = vrsqrt.f32 %v1059_v49 }
 0x284   :  { %1080 = vperm.xlu1 %1448, %v1066_v30  }
 0x28c   :  { %v1474_v5 = vpop.eup %1473 }
 0x28d   :  { %v1067_v17 = vmul.f32 %v1474_v5, %v1055_v45  ;;  %v1159_v5 = vpop.permute.xlu0 %1158 }
 0x28f   :  { %1085 = vperm.xlu1 %1448, %v1067_v17  }
 0x293   :  { %1173 = vperm.xlu1 %1448, %v1155_v59  }
 0x2ef   :  { %v1071_v34 = vpop.permute.xlu1 %1070 }
 0x2f0   :  { %v1088_v18 = vmul.f32 %v1071_v34, %v1979_v48  ;;  %v1089_v32 = vmul.f32 %v1071_v34, %v1982_v3  ;;  %v1090_v24 = vmul.f32 %v1071_v34, %v1985_v19  ;;  %v1091_v55 = vmul.f32 %v1071_v34, %v1994_v61 }
 0x2f1   :  { %v1092_v20 = vmul.f32 %v1071_v34, %v1997_v52  ;;  %v1093_v9 = vmul.f32 %v1071_v34, %v2002_v63  ;;  %v1094_v51 = vmul.f32 %v1071_v34, %v2015_v16  ;;  %v1095_v49 = vmul.f32 %v1071_v34, %v2020_v22 }
 0x2f2   :  { %v1096_v30 = vmul.f32 %v1071_v34, %v2033_v0  ;;  %v1097_v45 = vmul.f32 %v1071_v34, %v2044_v1  ;;  %v1098_v48 = vmul.f32 %v1071_v34, %v2047_v29  ;;  %v1099_v3 = vmul.f32 %v1071_v34, %v2058_v33 }
 0x2f3   :  { %v1100_v19 = vmul.f32 %v1071_v34, %v2061_v37  ;;  %v1101_v61 = vmul.f32 %v1071_v34, %v2064_v42  ;;  %v1102_v52 = vmul.f32 %v1071_v34, %v2075_v13  ;;  %v1103_v63 = vmul.f32 %v1071_v34, %v2094_v23 }
 0x2f4   :  { %v1176_v16 = vadd.f32 %v1159_v5, %v1088_v18  ;;  %v1177_v17 = vadd.f32 %v1159_v5, %v1089_v32  ;;  %v1178_v22 = vadd.f32 %v1159_v5, %v1090_v24  ;;  %v1179_v59 = vadd.f32 %v1159_v5, %v1091_v55 }
 0x2f5   :  { %v1180_v0 = vadd.f32 %v1159_v5, %v1092_v20  ;;  %v1181_v47 = vadd.f32 %v1159_v5, %v1093_v9  ;;  %v1182_v1 = vadd.f32 %v1159_v5, %v1094_v51  ;;  %v1183_v36 = vadd.f32 %v1159_v5, %v1095_v49 }
 0x2f6   :  { %v1184_v29 = vadd.f32 %v1159_v5, %v1096_v30  ;;  %v1185_v62 = vadd.f32 %v1159_v5, %v1097_v45  ;;  %v1186_v33 = vadd.f32 %v1159_v5, %v1098_v48  ;;  %v1187_v7 = vadd.f32 %v1159_v5, %v1099_v3  ;;  %v2746_v48 = vld [vmem:[#allocation18_spill] sm:$0xff]  ;;  %v2747_v3 = vld [vmem:[#allocation19_spill] sm:$0xff] }
 0x2f7   :  { %v1188_v40 = vadd.f32 %v1159_v5, %v1100_v19  ;;  %v1189_v37 = vadd.f32 %v1159_v5, %v1101_v61  ;;  %v1190_v28 = vadd.f32 %v1159_v5, %v1102_v52  ;;  %v1191_v42 = vadd.f32 %v1159_v5, %v1103_v63  ;;  %v1076_v55 = vpop.permute.xlu0 %1075 }
 0x2f8   :  { %v1240_v27 = vmax.f32 %v1176_v16, 0.0  ;;  %v1241_v13 = vmax.f32 %v1177_v17, 0.0  ;;  %v1242_v31 = vmax.f32 %v1178_v22, 0.0  ;;  %v1243_v23 = vmax.f32 %v1179_v59, 0.0 }
 0x2f9   :  { %v1244_v34 = vmax.f32 %v1180_v0, 0.0  ;;  %v1245_v18 = vmax.f32 %v1181_v47, 0.0  ;;  %v1246_v32 = vmax.f32 %v1182_v1, 0.0  ;;  %v1247_v24 = vmax.f32 %v1183_v36, 0.0 }
 0x2fa   :  { %v1248_v20 = vmax.f32 %v1184_v29, 0.0  ;;  %v1249_v9 = vmax.f32 %v1185_v62, 0.0  ;;  %v1250_v51 = vmax.f32 %v1186_v33, 0.0  ;;  %v1251_v49 = vmax.f32 %v1187_v7, 0.0  ;;  %1304 = vst [vmem:[%s2655_s5] sm:$0xff] %v1240_v27  ;;  %1305 = vst [vmem:[%s2655_s5 + $0x8] sm:$0xff] %v1241_v13  ;;  %v2745_v27 = vld [vmem:[#allocation17_spill] sm:$0xff] }
 0x2fb   :  { %1306 = vst [vmem:[%s2655_s5 + $0x10] sm:$0xff] %v1242_v31  ;;  %1307 = vst [vmem:[%s2655_s5 + $0x18] sm:$0xff] %v1243_v23  ;;  %v1252_v36 = vmax.f32 %v1188_v40, 0.0  ;;  %v1253_v62 = vmax.f32 %v1189_v37, 0.0  ;;  %v1254_v47 = vmax.f32 %v1190_v28, 0.0  ;;  %v1255_v7 = vmax.f32 %v1191_v42, 0.0 }
 0x2fc   :  { %1308 = vst [vmem:[%s2655_s5 + $0x20] sm:$0xff] %v1244_v34  ;;  %1309 = vst [vmem:[%s2655_s5 + $0x28] sm:$0xff] %v1245_v18  ;;  %v2744_v40 = vld [vmem:[#allocation16_spill] sm:$0xff]  ;;  %v1105_v28 = vmul.f32 %v1076_v55, %v2745_v27  ;;  %v1106_v30 = vmul.f32 %v1076_v55, %v2026_v50  ;;  %v1107_v45 = vmul.f32 %v1076_v55, %v2039_v41 }
 0x2fd   :  { %1310 = vst [vmem:[%s2655_s5 + $0x30] sm:$0xff] %v1246_v32  ;;  %1311 = vst [vmem:[%s2655_s5 + $0x38] sm:$0xff] %v1247_v24  ;;  %v1104_v31 = vmul.f32 %v1076_v55, %v2744_v40  ;;  %v1108_v50 = vmul.f32 %v1076_v55, %v2746_v48  ;;  %v1109_v41 = vmul.f32 %v1076_v55, %v2747_v3  ;;  %v2748_v27 = vld [vmem:[#allocation20_spill] sm:$0xff] }
 0x2fe   :  { %1312 = vst [vmem:[%s2655_s5 + $0x40] sm:$0xff] %v1248_v20  ;;  %1313 = vst [vmem:[%s2655_s5 + $0x48] sm:$0xff] %v1249_v9  ;;  %v1110_v5 = vmul.f32 %v1076_v55, %v2089_v38  ;;  %v1111_v19 = vmul.f32 %v1076_v55, %v2104_v60  ;;  %v1112_v61 = vmul.f32 %v1076_v55, %v2120_v25 }
 0x2ff   :  { %1314 = vst [vmem:[%s2655_s5 + $0x50] sm:$0xff] %v1250_v51  ;;  %1315 = vst [vmem:[%s2655_s5 + $0x58] sm:$0xff] %v1251_v49  ;;  %v1113_v52 = vmul.f32 %v1076_v55, %v2136_v14  ;;  %v1114_v63 = vmul.f32 %v1076_v55, %v2142_v58  ;;  %v1115_v16 = vmul.f32 %v1076_v55, %v2152_v43 }
 0x300   :  { %1316 = vst [vmem:[%s2655_s5 + $0x60] sm:$0xff] %v1252_v36  ;;  %1317 = vst [vmem:[%s2655_s5 + $0x68] sm:$0xff] %v1253_v62  ;;  %v1116_v17 = vmul.f32 %v1076_v55, %v2158_v10  ;;  %v1117_v22 = vmul.f32 %v1076_v55, %v2184_v2  ;;  %v1118_v59 = vmul.f32 %v1076_v55, %v2212_v57 }
 0x301   :  { %1318 = vst [vmem:[%s2655_s5 + $0x70] sm:$0xff] %v1254_v47  ;;  %1319 = vst [vmem:[%s2655_s5 + $0x78] sm:$0xff] %v1255_v7  ;;  %v1119_v0 = vmul.f32 %v1076_v55, %v2222_v12  ;;  %v1192_v38 = vadd.f32 %v2376_v21, %v1104_v31  ;;  %v1193_v60 = vadd.f32 %v2376_v21, %v1105_v28 }
 0x302   :  { %v1194_v25 = vadd.f32 %v2376_v21, %v1106_v30  ;;  %v1195_v14 = vadd.f32 %v2376_v21, %v1107_v45  ;;  %v1196_v58 = vadd.f32 %v2376_v21, %v1108_v50  ;;  %v1197_v43 = vadd.f32 %v2376_v21, %v1109_v41  ;;  %v2749_v30 = vld [vmem:[#allocation21_spill] sm:$0xff]  ;;  %v2750_v41 = vld [vmem:[#allocation24_spill] sm:$0xff] }
 0x303   :  { %v1198_v10 = vadd.f32 %v2376_v21, %v1110_v5  ;;  %v1199_v2 = vadd.f32 %v2376_v21, %v1111_v19  ;;  %v1200_v57 = vadd.f32 %v2376_v21, %v1112_v61  ;;  %v1201_v12 = vadd.f32 %v2376_v21, %v1113_v52  ;;  %v1081_v51 = vpop.permute.xlu1 %1080  ;;  %v2751_v19 = vld [vmem:[#allocation25_spill] sm:$0xff] }
 0x304   :  { %v1202_v1 = vadd.f32 %v2376_v21, %v1114_v63  ;;  %v1203_v29 = vadd.f32 %v2376_v21, %v1115_v16  ;;  %v1204_v33 = vadd.f32 %v2376_v21, %v1116_v17  ;;  %v1205_v37 = vadd.f32 %v2376_v21, %v1117_v22  ;;  %v2752_v63 = vld [vmem:[#allocation9_spill] sm:$0xff]  ;;  %v1169_v22 = vpop.permute.xlu0 %1168 }
 0x305   :  { %v1206_v42 = vadd.f32 %v2376_v21, %v1118_v59  ;;  %v1207_v13 = vadd.f32 %v2376_v21, %v1119_v0  ;;  %v1256_v23 = vmax.f32 %v1192_v38, 0.0  ;;  %v1257_v34 = vmax.f32 %v1193_v60, 0.0 }
 0x306   :  { %v1258_v18 = vmax.f32 %v1194_v25, 0.0  ;;  %v1259_v32 = vmax.f32 %v1195_v14, 0.0  ;;  %v1260_v24 = vmax.f32 %v1196_v58, 0.0  ;;  %v1261_v55 = vmax.f32 %v1197_v43, 0.0 }
 0x307   :  { %v1262_v20 = vmax.f32 %v1198_v10, 0.0  ;;  %v1263_v9 = vmax.f32 %v1199_v2, 0.0  ;;  %v1264_v49 = vmax.f32 %v1200_v57, 0.0  ;;  %v1265_v36 = vmax.f32 %v1201_v12, 0.0  ;;  %1320 = vst [vmem:[%s2655_s5 + $0x80] sm:$0xff] %v1256_v23  ;;  %1321 = vst [vmem:[%s2655_s5 + $0x88] sm:$0xff] %v1257_v34 }
 0x308   :  { %v1266_v62 = vmax.f32 %v1202_v1, 0.0  ;;  %v1267_v47 = vmax.f32 %v1203_v29, 0.0  ;;  %1322 = vst [vmem:[%s2655_s5 + $0x90] sm:$0xff] %v1258_v18  ;;  %1323 = vst [vmem:[%s2655_s5 + $0x98] sm:$0xff] %v1259_v32  ;;  %v1268_v21 = vmax.f32 %v1204_v33, 0.0  ;;  %v1269_v7 = vmax.f32 %v1205_v37, 0.0 }
 0x309   :  { %v1270_v40 = vmax.f32 %v1206_v42, 0.0  ;;  %v1271_v31 = vmax.f32 %v1207_v13, 0.0  ;;  %1324 = vst [vmem:[%s2655_s5 + $0xa0] sm:$0xff] %v1260_v24  ;;  %1325 = vst [vmem:[%s2655_s5 + $0xa8] sm:$0xff] %v1261_v55  ;;  %v1120_v28 = vmul.f32 %v1081_v51, %v2748_v27  ;;  %v1121_v45 = vmul.f32 %v1081_v51, %v2749_v30 }
 0x30a   :  { %1326 = vst [vmem:[%s2655_s5 + $0xb0] sm:$0xff] %v1262_v20  ;;  %1327 = vst [vmem:[%s2655_s5 + $0xb8] sm:$0xff] %v1263_v9  ;;  %v1122_v48 = vmul.f32 %v1081_v51, %v2112_v44  ;;  %v1123_v50 = vmul.f32 %v1081_v51, %v2132_v8  ;;  %v1124_v44 = vmul.f32 %v1081_v51, %v2146_v46 }
 0x30b   :  { %1328 = vst [vmem:[%s2655_s5 + $0xc0] sm:$0xff] %v1264_v49  ;;  %1329 = vst [vmem:[%s2655_s5 + $0xc8] sm:$0xff] %v1265_v36  ;;  %v1125_v8 = vmul.f32 %v1081_v51, %v2162_v39  ;;  %v1126_v3 = vmul.f32 %v1081_v51, %v2170_v6  ;;  %v1127_v5 = vmul.f32 %v1081_v51, %v2750_v41  ;;  %v2753_v36 = vld [vmem:[#allocation22_spill] sm:$0xff] }
 0x30c   :  { %1330 = vst [vmem:[%s2655_s5 + $0xd0] sm:$0xff] %v1266_v62  ;;  %1331 = vst [vmem:[%s2655_s5 + $0xd8] sm:$0xff] %v1267_v47  ;;  %v1128_v61 = vmul.f32 %v1081_v51, %v2751_v19  ;;  %v1129_v52 = vmul.f32 %v1081_v51, %v2218_v35  ;;  %v1130_v16 = vmul.f32 %v1081_v51, %v2752_v63  ;;  %v2754_v47 = vld [vmem:[#allocation23_spill] sm:$0xff]  ;;  %v2762_v63 = vld [vmem:[#allocation6_spill] sm:$0xff] }
 0x30d   :  { %1332 = vst [vmem:[%s2655_s5 + $0xe0] sm:$0xff] %v1268_v21  ;;  %1333 = vst [vmem:[%s2655_s5 + $0xe8] sm:$0xff] %v1269_v7  ;;  %v1131_v17 = vmul.f32 %v1081_v51, %v2248_v26  ;;  %v1132_v59 = vmul.f32 %v1081_v51, %v2262_v53  ;;  %v1133_v0 = vmul.f32 %v1081_v51, %v2274_v54  ;;  %v2755_v7 = vld [vmem:[#allocation2_spill] sm:$0xff] }
 0x30e   :  { %1334 = vst [vmem:[%s2655_s5 + $0xf0] sm:$0xff] %v1270_v40  ;;  %1335 = vst [vmem:[%s2655_s5 + $0xf8] sm:$0xff] %v1271_v31  ;;  %v1134_v46 = vmul.f32 %v1081_v51, %v2286_v4  ;;  %v1135_v39 = vmul.f32 %v1081_v51, %v2298_v15  ;;  %v1208_v6 = vadd.f32 %v1169_v22, %v1120_v28  ;;  %v1086_v37 = vpop.permute.xlu1 %1085  ;;  %v2756_v31 = vld [vmem:[#allocation14_spill] sm:$0xff] }
 0x30f   :  { %v1209_v38 = vadd.f32 %v1169_v22, %v1121_v45  ;;  %v1210_v60 = vadd.f32 %v1169_v22, %v1122_v48  ;;  %v1211_v25 = vadd.f32 %v1169_v22, %v1123_v50  ;;  %v1212_v14 = vadd.f32 %v1169_v22, %v1124_v44  ;;  %v2757_v45 = vld [vmem:[#allocation3_spill] sm:$0xff] }
 0x310   :  { %v1213_v58 = vadd.f32 %v1169_v22, %v1125_v8  ;;  %v1214_v35 = vadd.f32 %v1169_v22, %v1126_v3  ;;  %v1215_v43 = vadd.f32 %v1169_v22, %v1127_v5  ;;  %v1216_v10 = vadd.f32 %v1169_v22, %v1128_v61  ;;  %v2758_v50 = vld [vmem:[#allocation11_spill] sm:$0xff]  ;;  %v2759_v3 = vld [vmem:[#allocation4_spill] sm:$0xff]  ;;  %v2760_v5 = vld [vmem:[#allocation13_spill] sm:$0xff] }
 0x311   :  { %v1217_v2 = vadd.f32 %v1169_v22, %v1129_v52  ;;  %v1218_v26 = vadd.f32 %v1169_v22, %v1130_v16  ;;  %v1219_v57 = vadd.f32 %v1169_v22, %v1131_v17  ;;  %v1220_v12 = vadd.f32 %v1169_v22, %v1132_v59  ;;  %v2761_v61 = vld [vmem:[#allocation5_spill] sm:$0xff]  ;;  %v2763_v17 = vld [vmem:[#allocation7_spill] sm:$0xff]  ;;  %v2764_v59 = vld [vmem:[#allocation8_spill] sm:$0xff] }
 0x312   :  { %v1221_v53 = vadd.f32 %v1169_v22, %v1133_v0  ;;  %v1222_v1 = vadd.f32 %v1169_v22, %v1134_v46  ;;  %v1223_v54 = vadd.f32 %v1169_v22, %v1135_v39  ;;  %v1272_v29 = vmax.f32 %v1208_v6, 0.0  ;;  %v1174_v8 = vpop.permute.xlu1 %1173 }
 0x313   :  { %v1273_v4 = vmax.f32 %v1209_v38, 0.0  ;;  %v1274_v33 = vmax.f32 %v1210_v60, 0.0  ;;  %v1275_v15 = vmax.f32 %v1211_v25, 0.0  ;;  %v1276_v42 = vmax.f32 %v1212_v14, 0.0 }
 0x314   :  { %v1277_v13 = vmax.f32 %v1213_v58, 0.0  ;;  %v1278_v23 = vmax.f32 %v1214_v35, 0.0  ;;  %v1279_v34 = vmax.f32 %v1215_v43, 0.0  ;;  %v1280_v18 = vmax.f32 %v1216_v10, 0.0  ;;  %1336 = vst [vmem:[%s2655_s5 + $0x100] sm:$0xff] %v1272_v29 }
 0x315   :  { %v1281_v32 = vmax.f32 %v1217_v2, 0.0  ;;  %v1282_v24 = vmax.f32 %v1218_v26, 0.0  ;;  %v1283_v55 = vmax.f32 %v1219_v57, 0.0  ;;  %1337 = vst [vmem:[%s2655_s5 + $0x108] sm:$0xff] %v1273_v4  ;;  %1338 = vst [vmem:[%s2655_s5 + $0x110] sm:$0xff] %v1274_v33  ;;  %v1284_v20 = vmax.f32 %v1220_v12, 0.0 }
 0x316   :  { %1339 = vst [vmem:[%s2655_s5 + $0x118] sm:$0xff] %v1275_v15  ;;  %v1285_v9 = vmax.f32 %v1221_v53, 0.0  ;;  %v1286_v51 = vmax.f32 %v1222_v1, 0.0  ;;  %v1287_v49 = vmax.f32 %v1223_v54, 0.0  ;;  %1340 = vst [vmem:[%s2655_s5 + $0x120] sm:$0xff] %v1276_v42  ;;  %v1136_v62 = vmul.f32 %v1086_v37, %v2753_v36 }
 0x317   :  { %1341 = vst [vmem:[%s2655_s5 + $0x128] sm:$0xff] %v1277_v13  ;;  %1342 = vst [vmem:[%s2655_s5 + $0x130] sm:$0xff] %v1278_v23  ;;  %v1137_v21 = vmul.f32 %v1086_v37, %v2754_v47  ;;  %v1138_v40 = vmul.f32 %v1086_v37, %v2755_v7  ;;  %v1139_v27 = vmul.f32 %v1086_v37, %v2756_v31 }
 0x318   :  { %1343 = vst [vmem:[%s2655_s5 + $0x138] sm:$0xff] %v1279_v34  ;;  %1344 = vst [vmem:[%s2655_s5 + $0x140] sm:$0xff] %v1280_v18  ;;  %v1140_v28 = vmul.f32 %v1086_v37, %v2240_v11  ;;  %v1141_v30 = vmul.f32 %v1086_v37, %v2254_v56  ;;  %v1142_v48 = vmul.f32 %v1086_v37, %v2757_v45  ;;  %v2765_v11 = vld [vmem:[#allocation10_spill] sm:$0xff]  ;;  %v2766_v56 = vld [vmem:[#allocation12_spill] sm:$0xff] }
 0x319   :  { %1345 = vst [vmem:[%s2655_s5 + $0x148] sm:$0xff] %v1281_v32  ;;  %1346 = vst [vmem:[%s2655_s5 + $0x150] sm:$0xff] %v1282_v24  ;;  %v1143_v44 = vmul.f32 %v1086_v37, %v2758_v50  ;;  %v1144_v41 = vmul.f32 %v1086_v37, %v2759_v3  ;;  %v1145_v19 = vmul.f32 %v1086_v37, %v2760_v5 }
 0x31a   :  { %1347 = vst [vmem:[%s2655_s5 + $0x158] sm:$0xff] %v1283_v55  ;;  %1348 = vst [vmem:[%s2655_s5 + $0x160] sm:$0xff] %v1284_v20  ;;  %v1146_v52 = vmul.f32 %v1086_v37, %v2761_v61  ;;  %v1147_v16 = vmul.f32 %v1086_v37, %v2762_v63  ;;  %v1148_v22 = vmul.f32 %v1086_v37, %v2763_v17 }
 0x31b   :  { %1349 = vst [vmem:[%s2655_s5 + $0x168] sm:$0xff] %v1285_v9  ;;  %1350 = vst [vmem:[%s2655_s5 + $0x170] sm:$0xff] %v1286_v51  ;;  %v1149_v0 = vmul.f32 %v1086_v37, %v2764_v59  ;;  %v1150_v46 = vmul.f32 %v1086_v37, %v2765_v11  ;;  %v1151_v39 = vmul.f32 %v1086_v37, %v2766_v56 }
 0x31c   :  { %1351 = vst [vmem:[%s2655_s5 + $0x178] sm:$0xff] %v1287_v49  ;;  %v1224_v6 = vadd.f32 %v1174_v8, %v1136_v62  ;;  %v1225_v38 = vadd.f32 %v1174_v8, %v1137_v21  ;;  %v1226_v60 = vadd.f32 %v1174_v8, %v1138_v40  ;;  %v1227_v25 = vadd.f32 %v1174_v8, %v1139_v27 }
 0x31d   :  { %v1228_v14 = vadd.f32 %v1174_v8, %v1140_v28  ;;  %v1229_v58 = vadd.f32 %v1174_v8, %v1141_v30  ;;  %v1230_v35 = vadd.f32 %v1174_v8, %v1142_v48  ;;  %v1231_v43 = vadd.f32 %v1174_v8, %v1143_v44 }
 0x31e   :  { %v1232_v10 = vadd.f32 %v1174_v8, %v1144_v41  ;;  %v1233_v2 = vadd.f32 %v1174_v8, %v1145_v19  ;;  %v1234_v26 = vadd.f32 %v1174_v8, %v1146_v52  ;;  %v1235_v57 = vadd.f32 %v1174_v8, %v1147_v16 }
 0x31f   :  { %v1236_v12 = vadd.f32 %v1174_v8, %v1148_v22  ;;  %v1237_v53 = vadd.f32 %v1174_v8, %v1149_v0  ;;  %v1238_v1 = vadd.f32 %v1174_v8, %v1150_v46  ;;  %v1239_v54 = vadd.f32 %v1174_v8, %v1151_v39 }
 0x320   :  { %v1288_v29 = vmax.f32 %v1224_v6, 0.0  ;;  %v1289_v4 = vmax.f32 %v1225_v38, 0.0  ;;  %v1290_v33 = vmax.f32 %v1226_v60, 0.0  ;;  %v1291_v15 = vmax.f32 %v1227_v25, 0.0 }
 0x321   :  { %v1292_v37 = vmax.f32 %v1228_v14, 0.0  ;;  %v1293_v42 = vmax.f32 %v1229_v58, 0.0  ;;  %v1294_v13 = vmax.f32 %v1230_v35, 0.0  ;;  %v1295_v23 = vmax.f32 %v1231_v43, 0.0 }
 0x322   :  { %v1296_v34 = vmax.f32 %v1232_v10, 0.0  ;;  %v1297_v18 = vmax.f32 %v1233_v2, 0.0  ;;  %v1298_v32 = vmax.f32 %v1234_v26, 0.0  ;;  %v1299_v24 = vmax.f32 %v1235_v57, 0.0  ;;  %1352 = vst [vmem:[%s2655_s5 + $0x180] sm:$0xff] %v1288_v29  ;;  %1353 = vst [vmem:[%s2655_s5 + $0x188] sm:$0xff] %v1289_v4 }
 0x323   :  { %1354 = vst [vmem:[%s2655_s5 + $0x190] sm:$0xff] %v1290_v33  ;;  %1355 = vst [vmem:[%s2655_s5 + $0x198] sm:$0xff] %v1291_v15  ;;  %v1300_v55 = vmax.f32 %v1236_v12, 0.0  ;;  %v1301_v20 = vmax.f32 %v1237_v53, 0.0  ;;  %v1302_v9 = vmax.f32 %v1238_v1, 0.0  ;;  %v1303_v51 = vmax.f32 %v1239_v54, 0.0 }
 0x324   :  { %1356 = vst [vmem:[%s2655_s5 + $0x1a0] sm:$0xff] %v1292_v37  ;;  %1357 = vst [vmem:[%s2655_s5 + $0x1a8] sm:$0xff] %v1293_v42 }
 0x325   :  { %1358 = vst [vmem:[%s2655_s5 + $0x1b0] sm:$0xff] %v1294_v13  ;;  %1359 = vst [vmem:[%s2655_s5 + $0x1b8] sm:$0xff] %v1295_v23 }
 0x326   :  { %1360 = vst [vmem:[%s2655_s5 + $0x1c0] sm:$0xff] %v1296_v34  ;;  %1361 = vst [vmem:[%s2655_s5 + $0x1c8] sm:$0xff] %v1297_v18 }
 0x327   :  { %1362 = vst [vmem:[%s2655_s5 + $0x1d0] sm:$0xff] %v1298_v32  ;;  %1363 = vst [vmem:[%s2655_s5 + $0x1d8] sm:$0xff] %v1299_v24 }
 0x328   :  { %1364 = vst [vmem:[%s2655_s5 + $0x1e0] sm:$0xff] %v1300_v55  ;;  %1365 = vst [vmem:[%s2655_s5 + $0x1e8] sm:$0xff] %v1301_v20 }
 0x329   :  { %1366 = vst [vmem:[%s2655_s5 + $0x1f0] sm:$0xff] %v1302_v9  ;;  %1367 = vst [vmem:[%s2655_s5 + $0x1f8] sm:$0xff] %v1303_v51 }

</bundles_post_ra>
